<compile_context>
chip_gen: v7x
topology: tpu7x:2x2x1
jax: 0.10.0
libtpu: 0.0.40
codegen_flags: <defaults>
</compile_context>

<pallas_src>
import functools

import jax
import jax.numpy as jnp
import numpy as np
from jax.experimental import pallas as pl
from jax.experimental.pallas import tpu as pltpu

# ----------------------------- sizes (small, synthetic) -----------------------------
HIDDEN = 32          # hidden_size
C_LNKD = 4           # cond_lnKD_size
C_SEL = 4            # cond_SelectPtoM_size
DEPTH = 3            # GRU depth
VOCAB = 20           # embedding vocab
D_IN = HIDDEN + C_LNKD + C_SEL   # GraphGRU "input_size" after conditioning concat

N_NODES = 8          # total nodes across the batch
N_MESS = 13          # number of messages (index 0 is the dummy/pad message)
K_MESS = 3           # max neighbors per message   (mess_graph width)
K_NODE = 3           # max neighbors per node      (node_graph width)
SCOPE = ((0, 4), (4, 4))   # two trees of 4 nodes each (tuple -> hashable/static)

# One-hot / count gather operands go to the MXU in bf16 (exact values, f32 accumulate).
GATHER_DTYPE = jnp.bfloat16


# ----------------------------- fused Pallas kernel -----------------------------
def jtnn_fused_kernel(x_ref, gcat_ref, gsum_ref, mask_ref,
                      wxcat_ref, bxcat_ref, wzh_ref, ur_ref, whh_ref,
                      f_ref, adj_ref, wof_ref, wom_ref, bo_ref,
                      msg_ref, node_ref):
    """GraphGRU depth loop + outputNN in a single kernel.

    x_ref     : (Mp, D_IN)       fmess features (zero-padded rows)
    gcat_ref  : (K*Mp, Mp) bf16  stacked one-hot gather; row k*Mp+m == one_hot(mess_graph[m,k])
    gsum_ref  : (Mp, Mp)   bf16  sum_k gather; gsum @ h == h_nei.sum(1)
    mask_ref  : (Mp, H)          row mask (row 0 and pad rows == 0)
    wxcat_ref : (D_IN, 3H)       [Wz_x | Wr | Wh_x]
    bxcat_ref : (1, 3H)          [bz   | b_ur | bh]
    wzh/ur/whh: (H, H)           GRU hidden-side weights
    f_ref     : (N, D_IN)        conditioned node features
    adj_ref   : (N, Mp)    bf16  neighbor count matrix; adj @ messages == mess_nei.sum(1)
    wof/wom/bo:                  outputNN weights
    msg_ref   : (Mp, H)          out: messages
    node_ref  : (N, H)           out: node_vecs
    """
    m_pad, hidden = msg_ref.shape
    k_nei = gcat_ref.shape[0] // m_pad

    x = x_ref[...]
    mask = mask_ref[...]
    gcat = gcat_ref[...]
    gsum = gsum_ref[...]
    wzh = wzh_ref[...]
    ur = ur_ref[...]
    whh = whh_ref[...]

    # Single fused x-projection (loop-invariant): one (Mp, D_IN) x (D_IN, 3H) matmul.
    xproj = (jnp.dot(x, wxcat_ref[...], preferred_element_type=jnp.float32)
             + bxcat_ref[...])
    xz = xproj[:, :hidden]                     # W_z(x) + bz
    r1b = xproj[:, hidden:2 * hidden]          # W_r(x) + b_ur  (bias hoisted)
    xh = xproj[:, 2 * hidden:]                 # W_h(x) + bh
    # r1b replicated once per neighbor slot, hoisted out of the depth loop.
    r1b_k = jnp.concatenate([r1b] * k_nei, axis=0)          # (K*Mp, H)

    h = jnp.zeros((m_pad, hidden), jnp.float32)
    for _ in range(DEPTH):
        h_b = h.astype(GATHER_DTYPE)
        # gather: h_nei[k*Mp+m] == h[mess_graph[m,k]]; sum_h == h_nei.sum over k
        h_nei = jnp.dot(gcat, h_b, preferred_element_type=jnp.float32)   # (K*Mp, H)
        sum_h = jnp.dot(gsum, h_b, preferred_element_type=jnp.float32)   # (Mp, H)

        z = jax.nn.sigmoid(
            xz + jnp.dot(sum_h, wzh, preferred_element_type=jnp.float32))

        r = jax.nn.sigmoid(
            r1b_k + jnp.dot(h_nei, ur, preferred_element_type=jnp.float32))
        gated = r * h_nei                                                # (K*Mp, H)
        # reduce over k with aligned static row-slices (Mp multiple of 8)
        sum_gated = gated[:m_pad]
        for k in range(1, k_nei):
            sum_gated = sum_gated + gated[k * m_pad:(k + 1) * m_pad]

        pre_h = jnp.tanh(
            xh + jnp.dot(sum_gated, whh, preferred_element_type=jnp.float32))

        h = ((1.0 - z) * sum_h + z * pre_h) * mask

    msg_ref[...] = h

    # ---- outputNN: relu(Linear(cat([fnode, sum_nei(messages)]))) ----
    mess_sum = jnp.dot(adj_ref[...], h.astype(GATHER_DTYPE),
                       preferred_element_type=jnp.float32)               # (N, H)
    pre = (jnp.dot(f_ref[...], wof_ref[...], preferred_element_type=jnp.float32)
           + jnp.dot(mess_sum, wom_ref[...], preferred_element_type=jnp.float32)
           + bo_ref[...])
    node_ref[...] = jnp.maximum(pre, 0.0)


def _vmem_specs(n):
    return [pl.BlockSpec(memory_space=pltpu.MemorySpace.VMEM) for _ in range(n)]


# ----------------------------- wrapper (one jit around everything) -----------------------------
@functools.partial(jax.jit, static_argnames=("scope",))
def jtnn_encoder_forward(params, fnode, fmess, node_graph, mess_graph, scope,
                         cond_lnKD, cond_SelectPtoM):
    # --- glue: embedding + conditioning concat (matches torch.cat order) ---
    emb = params["embedding"][fnode]                                          # (N, H)
    fnode_feat = jnp.concatenate([emb, cond_lnKD, cond_SelectPtoM], axis=1)   # (N, D_IN)
    x = fnode_feat[fmess]                                                     # (M, D_IN)

    M = mess_graph.shape[0]
    m_pad = ((M + 7) // 8) * 8
    pad = m_pad - M

    x_p = jnp.pad(x, ((0, pad), (0, 0)))                                      # (Mp, D_IN)

    # one-hot gather matrices (exact in bf16)
    G = jax.nn.one_hot(mess_graph, m_pad, dtype=GATHER_DTYPE)                 # (M, K, Mp)
    G = jnp.pad(G, ((0, pad), (0, 0), (0, 0)))                                # (Mp, K, Mp)
    gcat = jnp.transpose(G, (1, 0, 2)).reshape(K_MESS * m_pad, m_pad)         # (K*Mp, Mp)
    gsum = G.sum(axis=1).astype(GATHER_DTYPE)                                 # (Mp, Mp)

    # mask: dummy message 0 and padded rows stay zero
    mask = jnp.zeros((m_pad, HIDDEN), jnp.float32).at[1:M, :].set(1.0)

    # node neighbor count matrix (N, Mp); message 0 / pads contribute zeros
    node_adj = jax.nn.one_hot(node_graph, m_pad,
                              dtype=GATHER_DTYPE).sum(axis=1).astype(GATHER_DTYPE)

    # merged x-side weights / biases
    wxcat = jnp.concatenate([params["Wz_x"], params["Wr"], params["Wh_x"]], axis=1)
    bxcat = jnp.concatenate([params["bz"], params["b_ur"], params["bh"]], axis=1)

    inputs = (x_p, gcat, gsum, mask,
              wxcat, bxcat, params["Wz_h"], params["Ur"], params["Wh_h"],
              fnode_feat, node_adj, params["Wo_f"], params["Wo_m"], params["bo"])

    messages_p, node_vecs = pl.pallas_call(
        jtnn_fused_kernel,
        out_shape=(jax.ShapeDtypeStruct((m_pad, HIDDEN), jnp.float32),
                   jax.ShapeDtypeStruct((fnode_feat.shape[0], HIDDEN), jnp.float32)),
        in_specs=_vmem_specs(len(inputs)),
        out_specs=(pl.BlockSpec(memory_space=pltpu.MemorySpace.VMEM),
                   pl.BlockSpec(memory_space=pltpu.MemorySpace.VMEM)),
    )(*inputs)

    messages = messages_p[:M]

    # --- glue: per-tree root selection (scope) ---
    starts = jnp.array([st for st, _ in scope], dtype=jnp.int32)
    tree_vecs = node_vecs[starts]                                             # (B, H)
    return tree_vecs, messages

# TODO(synk): at real JTVAE sizes (M ~ 2-4k) the O(M^2) one-hot gather should be
# replaced by a scalar-prefetch / DMA gather (PrefetchScalarGridSpec + pl.Element)
# so the gather operand never materializes (64 MiB VMEM on v7x).


# ----------------------------- pure-JAX reference (PyTorch semantics, f32) -----------------------------
def reference_forward(params, fnode, fmess, node_graph, mess_graph, scope,
                      cond_lnKD, cond_SelectPtoM):
    emb = params["embedding"][fnode]
    fnode_feat = jnp.concatenate([emb, cond_lnKD, cond_SelectPtoM], axis=1)
    x = fnode_feat[fmess]

    M = mess_graph.shape[0]
    h = jnp.zeros((M, HIDDEN), jnp.float32)
    mask = jnp.ones((M, 1), jnp.float32).at[0, 0].set(0.0)

    Wz = jnp.concatenate([params["Wz_x"], params["Wz_h"]], axis=0)
    Wh = jnp.concatenate([params["Wh_x"], params["Wh_h"]], axis=0)
    for _ in range(DEPTH):
        h_nei = h[mess_graph]                       # (M, K, H)
        sum_h = h_nei.sum(axis=1)
        z = jax.nn.sigmoid(jnp.concatenate([x, sum_h], axis=1) @ Wz + params["bz"])
        r1 = (x @ params["Wr"]).reshape(-1, 1, HIDDEN)
        r2 = h_nei @ params["Ur"] + params["b_ur"]
        r = jax.nn.sigmoid(r1 + r2)
        sum_gated = (r * h_nei).sum(axis=1)
        pre_h = jnp.tanh(jnp.concatenate([x, sum_gated], axis=1) @ Wh + params["bh"])
        h = (1.0 - z) * sum_h + z * pre_h
        h = h * mask

    mess_nei = h[node_graph].sum(axis=1)
    Wo = jnp.concatenate([params["Wo_f"], params["Wo_m"]], axis=0)
    node_vecs = jnp.concatenate([fnode_feat, mess_nei], axis=1) @ Wo + params["bo"]
    node_vecs = jnp.maximum(node_vecs, 0.0)
    starts = jnp.array([st for st, _ in scope], dtype=jnp.int32)
    return node_vecs[starts], h


# ----------------------------- param init / main -----------------------------
def init_params(key):
    ks = jax.random.split(key, 16)
    def lin(k, fan_in, fan_out):
        return jax.random.normal(k, (fan_in, fan_out), jnp.float32) * 0.1
    p = {
        "embedding": jax.random.normal(ks[0], (VOCAB, HIDDEN), jnp.float32) * 0.1,
        # GraphGRU
        "Wz_x": lin(ks[1], D_IN, HIDDEN), "Wz_h": lin(ks[2], HIDDEN, HIDDEN),
        "bz": jax.random.normal(ks[3], (1, HIDDEN), jnp.float32) * 0.1,
        "Wr": lin(ks[4], D_IN, HIDDEN),                      # no bias
        "Ur": lin(ks[5], HIDDEN, HIDDEN),
        "b_ur": jax.random.normal(ks[6], (1, HIDDEN), jnp.float32) * 0.1,
        "Wh_x": lin(ks[7], D_IN, HIDDEN), "Wh_h": lin(ks[8], HIDDEN, HIDDEN),
        "bh": jax.random.normal(ks[9], (1, HIDDEN), jnp.float32) * 0.1,
        # outputNN
        "Wo_f": lin(ks[10], D_IN, HIDDEN), "Wo_m": lin(ks[11], HIDDEN, HIDDEN),
        "bo": jax.random.normal(ks[12], (1, HIDDEN), jnp.float32) * 0.1,
    }
    return p


if __name__ == "__main__":
    key = jax.random.PRNGKey(0)
    kp, k1, k2, k3, k4, k5, k6 = jax.random.split(key, 7)

    params = init_params(kp)

    fnode = jax.random.randint(k1, (N_NODES,), 0, VOCAB)                 # node vocab ids
    fmess = jax.random.randint(k2, (N_MESS,), 0, N_NODES).at[0].set(0)   # source node of each message
    node_graph = jax.random.randint(k3, (N_NODES, K_NODE), 0, N_MESS)    # message ids per node (0 = pad)
    mess_graph = jax.random.randint(k4, (N_MESS, K_MESS), 0, N_MESS)     # predecessor message ids (0 = pad)
    mess_graph = mess_graph.at[0].set(0)
    cond_lnKD = jax.random.normal(k5, (N_NODES, C_LNKD), jnp.float32)
    cond_SelectPtoM = jax.random.normal(k6, (N_NODES, C_SEL), jnp.float32)

    tree_vecs, messages = jtnn_encoder_forward(
        params, fnode, fmess, node_graph, mess_graph, SCOPE, cond_lnKD, cond_SelectPtoM)
    jax.block_until_ready((tree_vecs, messages))

    ref_tree, ref_msgs = reference_forward(
        params, fnode, fmess, node_graph, mess_graph, SCOPE, cond_lnKD, cond_SelectPtoM)

    # bf16 gather operands (h rounded to bf16 before the MXU gather, f32 accumulate)
    # introduce ~2^-9 relative rounding vs the all-f32 PyTorch-exact reference.
    np.testing.assert_allclose(np.asarray(messages), np.asarray(ref_msgs),
                               rtol=5e-3, atol=5e-3)
    np.testing.assert_allclose(np.asarray(tree_vecs), np.asarray(ref_tree),
                               rtol=5e-3, atol=5e-3)

    assert tree_vecs.shape == (len(SCOPE), HIDDEN)
    assert messages.shape == (N_MESS, HIDDEN)
    print("KERNEL_OK")
</pallas_src>

<mosaic_0001>
module attributes {stable_mosaic.version = 11 : i64} {
  func.func @jtnn_fused_kernel(%arg0: memref<16x40xf32, #tpu.memory_space<vmem>>, %arg1: memref<48x16xbf16, #tpu.memory_space<vmem>>, %arg2: memref<16x16xbf16, #tpu.memory_space<vmem>>, %arg3: memref<16x32xf32, #tpu.memory_space<vmem>>, %arg4: memref<40x96xf32, #tpu.memory_space<vmem>>, %arg5: memref<1x96xf32, #tpu.memory_space<vmem>>, %arg6: memref<32x32xf32, #tpu.memory_space<vmem>>, %arg7: memref<32x32xf32, #tpu.memory_space<vmem>>, %arg8: memref<32x32xf32, #tpu.memory_space<vmem>>, %arg9: memref<8x40xf32, #tpu.memory_space<vmem>>, %arg10: memref<8x16xbf16, #tpu.memory_space<vmem>>, %arg11: memref<40x32xf32, #tpu.memory_space<vmem>>, %arg12: memref<32x32xf32, #tpu.memory_space<vmem>>, %arg13: memref<1x32xf32, #tpu.memory_space<vmem>>, %arg14: memref<16x32xf32, #tpu.memory_space<vmem>>, %arg15: memref<8x32xf32, #tpu.memory_space<vmem>>) attributes {dimension_semantics = [], scalar_prefetch = 0 : i64, scratch_operands = 0 : i64, tpu.core_type = #tpu.core_type<tc>} {
    %c0 = arith.constant 0 : index
    %c0_0 = arith.constant 0 : index
    %0 = vector.load %arg0[%c0, %c0_0] : memref<16x40xf32, #tpu.memory_space<vmem>>, vector<16x40xf32>
    %c0_1 = arith.constant 0 : index
    %c0_2 = arith.constant 0 : index
    %1 = vector.load %arg3[%c0_1, %c0_2] : memref<16x32xf32, #tpu.memory_space<vmem>>, vector<16x32xf32>
    %c0_3 = arith.constant 0 : index
    %c0_4 = arith.constant 0 : index
    %2 = vector.load %arg1[%c0_3, %c0_4] : memref<48x16xbf16, #tpu.memory_space<vmem>>, vector<48x16xbf16>
    %c0_5 = arith.constant 0 : index
    %c0_6 = arith.constant 0 : index
    %3 = vector.load %arg2[%c0_5, %c0_6] : memref<16x16xbf16, #tpu.memory_space<vmem>>, vector<16x16xbf16>
    %c0_7 = arith.constant 0 : index
    %c0_8 = arith.constant 0 : index
    %4 = vector.load %arg6[%c0_7, %c0_8] : memref<32x32xf32, #tpu.memory_space<vmem>>, vector<32x32xf32>
    %c0_9 = arith.constant 0 : index
    %c0_10 = arith.constant 0 : index
    %5 = vector.load %arg7[%c0_9, %c0_10] : memref<32x32xf32, #tpu.memory_space<vmem>>, vector<32x32xf32>
    %c0_11 = arith.constant 0 : index
    %c0_12 = arith.constant 0 : index
    %6 = vector.load %arg8[%c0_11, %c0_12] : memref<32x32xf32, #tpu.memory_space<vmem>>, vector<32x32xf32>
    %c0_13 = arith.constant 0 : index
    %c0_14 = arith.constant 0 : index
    %7 = vector.load %arg4[%c0_13, %c0_14] : memref<40x96xf32, #tpu.memory_space<vmem>>, vector<40x96xf32>
    %cst = arith.constant dense<0.000000e+00> : vector<16x96xf32>
    %8 = tpu.matmul %0, %7, %cst {dimension_numbers = #tpu.dot_dimension_numbers<[1], [0], [0], [1], [0, 0, 1, 1], [], []>} : vector<16x40xf32>, vector<40x96xf32>, vector<16x96xf32> -> vector<16x96xf32>
    %c0_15 = arith.constant 0 : index
    %c0_16 = arith.constant 0 : index
    %9 = vector.load %arg5[%c0_15, %c0_16] : memref<1x96xf32, #tpu.memory_space<vmem>>, vector<1x96xf32>
    %10 = vector.broadcast %9 : vector<1x96xf32> to vector<16x96xf32>
    %11 = arith.addf %8, %10 : vector<16x96xf32>
    %12 = vector.extract_strided_slice %11 {offsets = [0, 0], sizes = [16, 32], strides = [1, 1]} : vector<16x96xf32> to vector<16x32xf32>
    %13 = vector.extract_strided_slice %11 {offsets = [0, 32], sizes = [16, 32], strides = [1, 1]} : vector<16x96xf32> to vector<16x32xf32>
    %14 = vector.extract_strided_slice %11 {offsets = [0, 64], sizes = [16, 32], strides = [1, 1]} : vector<16x96xf32> to vector<16x32xf32>
    %15 = tpu.concatenate %13, %13, %13 in 0 : vector<16x32xf32>, vector<16x32xf32>, vector<16x32xf32> -> vector<48x32xf32>
    %cst_17 = arith.constant 0.000000e+00 : f32
    %16 = vector.broadcast %cst_17 : f32 to vector<16x32xf32>
    %17 = arith.truncf %16 : vector<16x32xf32> to vector<16x32xbf16>
    %cst_18 = arith.constant dense<0.000000e+00> : vector<48x32xf32>
    %18 = tpu.matmul %2, %17, %cst_18 {dimension_numbers = #tpu.dot_dimension_numbers<[1], [0], [0], [1], [0, 0, 1, 1], [], []>} : vector<48x16xbf16>, vector<16x32xbf16>, vector<48x32xf32> -> vector<48x32xf32>
    %cst_19 = arith.constant dense<0.000000e+00> : vector<16x32xf32>
    %19 = tpu.matmul %3, %17, %cst_19 {dimension_numbers = #tpu.dot_dimension_numbers<[1], [0], [0], [1], [0, 0, 1, 1], [], []>} : vector<16x16xbf16>, vector<16x32xbf16>, vector<16x32xf32> -> vector<16x32xf32>
    %cst_20 = arith.constant dense<0.000000e+00> : vector<16x32xf32>
    %20 = tpu.matmul %19, %4, %cst_20 {dimension_numbers = #tpu.dot_dimension_numbers<[1], [0], [0], [1], [0, 0, 1, 1], [], []>} : vector<16x32xf32>, vector<32x32xf32>, vector<16x32xf32> -> vector<16x32xf32>
    %21 = arith.addf %12, %20 : vector<16x32xf32>
    %22 = arith.negf %21 : vector<16x32xf32>
    %23 = math.exp %22 : vector<16x32xf32>
    %cst_21 = arith.constant 1.000000e+00 : f32
    %24 = vector.broadcast %cst_21 : f32 to vector<16x32xf32>
    %25 = arith.addf %24, %23 : vector<16x32xf32>
    %26 = arith.divf %24, %25 : vector<16x32xf32>
    %cst_22 = arith.constant dense<0.000000e+00> : vector<48x32xf32>
    %27 = tpu.matmul %18, %5, %cst_22 {dimension_numbers = #tpu.dot_dimension_numbers<[1], [0], [0], [1], [0, 0, 1, 1], [], []>} : vector<48x32xf32>, vector<32x32xf32>, vector<48x32xf32> -> vector<48x32xf32>
    %28 = arith.addf %15, %27 : vector<48x32xf32>
    %29 = arith.negf %28 : vector<48x32xf32>
    %30 = math.exp %29 : vector<48x32xf32>
    %cst_23 = arith.constant 1.000000e+00 : f32
    %31 = vector.broadcast %cst_23 : f32 to vector<48x32xf32>
    %32 = arith.addf %31, %30 : vector<48x32xf32>
    %33 = arith.divf %31, %32 : vector<48x32xf32>
    %34 = arith.mulf %33, %18 : vector<48x32xf32>
    %35 = vector.extract_strided_slice %34 {offsets = [0, 0], sizes = [16, 32], strides = [1, 1]} : vector<48x32xf32> to vector<16x32xf32>
    %36 = vector.extract_strided_slice %34 {offsets = [16, 0], sizes = [16, 32], strides = [1, 1]} : vector<48x32xf32> to vector<16x32xf32>
    %37 = arith.addf %35, %36 : vector<16x32xf32>
    %38 = vector.extract_strided_slice %34 {offsets = [32, 0], sizes = [16, 32], strides = [1, 1]} : vector<48x32xf32> to vector<16x32xf32>
    %39 = arith.addf %37, %38 : vector<16x32xf32>
    %cst_24 = arith.constant dense<0.000000e+00> : vector<16x32xf32>
    %40 = tpu.matmul %39, %6, %cst_24 {dimension_numbers = #tpu.dot_dimension_numbers<[1], [0], [0], [1], [0, 0, 1, 1], [], []>} : vector<16x32xf32>, vector<32x32xf32>, vector<16x32xf32> -> vector<16x32xf32>
    %41 = arith.addf %14, %40 : vector<16x32xf32>
    %42 = math.tanh %41 : vector<16x32xf32>
    %cst_25 = arith.constant 1.000000e+00 : f32
    %43 = vector.broadcast %cst_25 : f32 to vector<16x32xf32>
    %44 = arith.subf %43, %26 : vector<16x32xf32>
    %45 = arith.mulf %44, %19 : vector<16x32xf32>
    %46 = arith.mulf %26, %42 : vector<16x32xf32>
    %47 = arith.addf %45, %46 : vector<16x32xf32>
    %48 = arith.mulf %47, %1 : vector<16x32xf32>
    %49 = arith.truncf %48 : vector<16x32xf32> to vector<16x32xbf16>
    %cst_26 = arith.constant dense<0.000000e+00> : vector<48x32xf32>
    %50 = tpu.matmul %2, %49, %cst_26 {dimension_numbers = #tpu.dot_dimension_numbers<[1], [0], [0], [1], [0, 0, 1, 1], [], []>} : vector<48x16xbf16>, vector<16x32xbf16>, vector<48x32xf32> -> vector<48x32xf32>
    %cst_27 = arith.constant dense<0.000000e+00> : vector<16x32xf32>
    %51 = tpu.matmul %3, %49, %cst_27 {dimension_numbers = #tpu.dot_dimension_numbers<[1], [0], [0], [1], [0, 0, 1, 1], [], []>} : vector<16x16xbf16>, vector<16x32xbf16>, vector<16x32xf32> -> vector<16x32xf32>
    %cst_28 = arith.constant dense<0.000000e+00> : vector<16x32xf32>
    %52 = tpu.matmul %51, %4, %cst_28 {dimension_numbers = #tpu.dot_dimension_numbers<[1], [0], [0], [1], [0, 0, 1, 1], [], []>} : vector<16x32xf32>, vector<32x32xf32>, vector<16x32xf32> -> vector<16x32xf32>
    %53 = arith.addf %12, %52 : vector<16x32xf32>
    %54 = arith.negf %53 : vector<16x32xf32>
    %55 = math.exp %54 : vector<16x32xf32>
    %cst_29 = arith.constant 1.000000e+00 : f32
    %56 = vector.broadcast %cst_29 : f32 to vector<16x32xf32>
    %57 = arith.addf %56, %55 : vector<16x32xf32>
    %58 = arith.divf %56, %57 : vector<16x32xf32>
    %cst_30 = arith.constant dense<0.000000e+00> : vector<48x32xf32>
    %59 = tpu.matmul %50, %5, %cst_30 {dimension_numbers = #tpu.dot_dimension_numbers<[1], [0], [0], [1], [0, 0, 1, 1], [], []>} : vector<48x32xf32>, vector<32x32xf32>, vector<48x32xf32> -> vector<48x32xf32>
    %60 = arith.addf %15, %59 : vector<48x32xf32>
    %61 = arith.negf %60 : vector<48x32xf32>
    %62 = math.exp %61 : vector<48x32xf32>
    %cst_31 = arith.constant 1.000000e+00 : f32
    %63 = vector.broadcast %cst_31 : f32 to vector<48x32xf32>
    %64 = arith.addf %63, %62 : vector<48x32xf32>
    %65 = arith.divf %63, %64 : vector<48x32xf32>
    %66 = arith.mulf %65, %50 : vector<48x32xf32>
    %67 = vector.extract_strided_slice %66 {offsets = [0, 0], sizes = [16, 32], strides = [1, 1]} : vector<48x32xf32> to vector<16x32xf32>
    %68 = vector.extract_strided_slice %66 {offsets = [16, 0], sizes = [16, 32], strides = [1, 1]} : vector<48x32xf32> to vector<16x32xf32>
    %69 = arith.addf %67, %68 : vector<16x32xf32>
    %70 = vector.extract_strided_slice %66 {offsets = [32, 0], sizes = [16, 32], strides = [1, 1]} : vector<48x32xf32> to vector<16x32xf32>
    %71 = arith.addf %69, %70 : vector<16x32xf32>
    %cst_32 = arith.constant dense<0.000000e+00> : vector<16x32xf32>
    %72 = tpu.matmul %71, %6, %cst_32 {dimension_numbers = #tpu.dot_dimension_numbers<[1], [0], [0], [1], [0, 0, 1, 1], [], []>} : vector<16x32xf32>, vector<32x32xf32>, vector<16x32xf32> -> vector<16x32xf32>
    %73 = arith.addf %14, %72 : vector<16x32xf32>
    %74 = math.tanh %73 : vector<16x32xf32>
    %cst_33 = arith.constant 1.000000e+00 : f32
    %75 = vector.broadcast %cst_33 : f32 to vector<16x32xf32>
    %76 = arith.subf %75, %58 : vector<16x32xf32>
    %77 = arith.mulf %76, %51 : vector<16x32xf32>
    %78 = arith.mulf %58, %74 : vector<16x32xf32>
    %79 = arith.addf %77, %78 : vector<16x32xf32>
    %80 = arith.mulf %79, %1 : vector<16x32xf32>
    %81 = arith.truncf %80 : vector<16x32xf32> to vector<16x32xbf16>
    %cst_34 = arith.constant dense<0.000000e+00> : vector<48x32xf32>
    %82 = tpu.matmul %2, %81, %cst_34 {dimension_numbers = #tpu.dot_dimension_numbers<[1], [0], [0], [1], [0, 0, 1, 1], [], []>} : vector<48x16xbf16>, vector<16x32xbf16>, vector<48x32xf32> -> vector<48x32xf32>
    %cst_35 = arith.constant dense<0.000000e+00> : vector<16x32xf32>
    %83 = tpu.matmul %3, %81, %cst_35 {dimension_numbers = #tpu.dot_dimension_numbers<[1], [0], [0], [1], [0, 0, 1, 1], [], []>} : vector<16x16xbf16>, vector<16x32xbf16>, vector<16x32xf32> -> vector<16x32xf32>
    %cst_36 = arith.constant dense<0.000000e+00> : vector<16x32xf32>
    %84 = tpu.matmul %83, %4, %cst_36 {dimension_numbers = #tpu.dot_dimension_numbers<[1], [0], [0], [1], [0, 0, 1, 1], [], []>} : vector<16x32xf32>, vector<32x32xf32>, vector<16x32xf32> -> vector<16x32xf32>
    %85 = arith.addf %12, %84 : vector<16x32xf32>
    %86 = arith.negf %85 : vector<16x32xf32>
    %87 = math.exp %86 : vector<16x32xf32>
    %cst_37 = arith.constant 1.000000e+00 : f32
    %88 = vector.broadcast %cst_37 : f32 to vector<16x32xf32>
    %89 = arith.addf %88, %87 : vector<16x32xf32>
    %90 = arith.divf %88, %89 : vector<16x32xf32>
    %cst_38 = arith.constant dense<0.000000e+00> : vector<48x32xf32>
    %91 = tpu.matmul %82, %5, %cst_38 {dimension_numbers = #tpu.dot_dimension_numbers<[1], [0], [0], [1], [0, 0, 1, 1], [], []>} : vector<48x32xf32>, vector<32x32xf32>, vector<48x32xf32> -> vector<48x32xf32>
    %92 = arith.addf %15, %91 : vector<48x32xf32>
    %93 = arith.negf %92 : vector<48x32xf32>
    %94 = math.exp %93 : vector<48x32xf32>
    %cst_39 = arith.constant 1.000000e+00 : f32
    %95 = vector.broadcast %cst_39 : f32 to vector<48x32xf32>
    %96 = arith.addf %95, %94 : vector<48x32xf32>
    %97 = arith.divf %95, %96 : vector<48x32xf32>
    %98 = arith.mulf %97, %82 : vector<48x32xf32>
    %99 = vector.extract_strided_slice %98 {offsets = [0, 0], sizes = [16, 32], strides = [1, 1]} : vector<48x32xf32> to vector<16x32xf32>
    %100 = vector.extract_strided_slice %98 {offsets = [16, 0], sizes = [16, 32], strides = [1, 1]} : vector<48x32xf32> to vector<16x32xf32>
    %101 = arith.addf %99, %100 : vector<16x32xf32>
    %102 = vector.extract_strided_slice %98 {offsets = [32, 0], sizes = [16, 32], strides = [1, 1]} : vector<48x32xf32> to vector<16x32xf32>
    %103 = arith.addf %101, %102 : vector<16x32xf32>
    %cst_40 = arith.constant dense<0.000000e+00> : vector<16x32xf32>
    %104 = tpu.matmul %103, %6, %cst_40 {dimension_numbers = #tpu.dot_dimension_numbers<[1], [0], [0], [1], [0, 0, 1, 1], [], []>} : vector<16x32xf32>, vector<32x32xf32>, vector<16x32xf32> -> vector<16x32xf32>
    %105 = arith.addf %14, %104 : vector<16x32xf32>
    %106 = math.tanh %105 : vector<16x32xf32>
    %cst_41 = arith.constant 1.000000e+00 : f32
    %107 = vector.broadcast %cst_41 : f32 to vector<16x32xf32>
    %108 = arith.subf %107, %90 : vector<16x32xf32>
    %109 = arith.mulf %108, %83 : vector<16x32xf32>
    %110 = arith.mulf %90, %106 : vector<16x32xf32>
    %111 = arith.addf %109, %110 : vector<16x32xf32>
    %112 = arith.mulf %111, %1 : vector<16x32xf32>
    %c0_42 = arith.constant 0 : index
    %c0_43 = arith.constant 0 : index
    %113 = vector.load %arg14[%c0_42, %c0_43] : memref<16x32xf32, #tpu.memory_space<vmem>>, vector<16x32xf32>
    tpu.vector_store %arg14[%c0_42, %c0_43], %112 {strides = array<i32>} : memref<16x32xf32, #tpu.memory_space<vmem>>, vector<16x32xf32>,
    %c0_44 = arith.constant 0 : index
    %c0_45 = arith.constant 0 : index
    %114 = vector.load %arg10[%c0_44, %c0_45] : memref<8x16xbf16, #tpu.memory_space<vmem>>, vector<8x16xbf16>
    %115 = arith.truncf %112 : vector<16x32xf32> to vector<16x32xbf16>
    %cst_46 = arith.constant dense<0.000000e+00> : vector<8x32xf32>
    %116 = tpu.matmul %114, %115, %cst_46 {dimension_numbers = #tpu.dot_dimension_numbers<[1], [0], [0], [1], [0, 0, 1, 1], [], []>} : vector<8x16xbf16>, vector<16x32xbf16>, vector<8x32xf32> -> vector<8x32xf32>
    %c0_47 = arith.constant 0 : index
    %c0_48 = arith.constant 0 : index
    %117 = vector.load %arg9[%c0_47, %c0_48] : memref<8x40xf32, #tpu.memory_space<vmem>>, vector<8x40xf32>
    %c0_49 = arith.constant 0 : index
    %c0_50 = arith.constant 0 : index
    %118 = vector.load %arg11[%c0_49, %c0_50] : memref<40x32xf32, #tpu.memory_space<vmem>>, vector<40x32xf32>
    %cst_51 = arith.constant dense<0.000000e+00> : vector<8x32xf32>
    %119 = tpu.matmul %117, %118, %cst_51 {dimension_numbers = #tpu.dot_dimension_numbers<[1], [0], [0], [1], [0, 0, 1, 1], [], []>} : vector<8x40xf32>, vector<40x32xf32>, vector<8x32xf32> -> vector<8x32xf32>
    %c0_52 = arith.constant 0 : index
    %c0_53 = arith.constant 0 : index
    %120 = vector.load %arg12[%c0_52, %c0_53] : memref<32x32xf32, #tpu.memory_space<vmem>>, vector<32x32xf32>
    %cst_54 = arith.constant dense<0.000000e+00> : vector<8x32xf32>
    %121 = tpu.matmul %116, %120, %cst_54 {dimension_numbers = #tpu.dot_dimension_numbers<[1], [0], [0], [1], [0, 0, 1, 1], [], []>} : vector<8x32xf32>, vector<32x32xf32>, vector<8x32xf32> -> vector<8x32xf32>
    %122 = arith.addf %119, %121 : vector<8x32xf32>
    %c0_55 = arith.constant 0 : index
    %c0_56 = arith.constant 0 : index
    %123 = vector.load %arg13[%c0_55, %c0_56] : memref<1x32xf32, #tpu.memory_space<vmem>>, vector<1x32xf32>
    %124 = vector.broadcast %123 : vector<1x32xf32> to vector<8x32xf32>
    %125 = arith.addf %122, %124 : vector<8x32xf32>
    %cst_57 = arith.constant 0.000000e+00 : f32
    %126 = vector.broadcast %cst_57 : f32 to vector<8x32xf32>
    %127 = arith.maximumf %125, %126 : vector<8x32xf32>
    %c0_58 = arith.constant 0 : index
    %c0_59 = arith.constant 0 : index
    %128 = vector.load %arg15[%c0_58, %c0_59] : memref<8x32xf32, #tpu.memory_space<vmem>>, vector<8x32xf32>
    tpu.vector_store %arg15[%c0_58, %c0_59], %127 {strides = array<i32>} : memref<8x32xf32, #tpu.memory_space<vmem>>, vector<8x32xf32>,
    return
  }
}

</mosaic_0001>

<bundles_post_ra>
// kernel: jtnn_encoder_forward.1
= control target key start
LH: loop header
LB: loop body
LE: loop exit
PB: predicated region body
PF: predicated region fallthrough
CT: control target
= control target key end

     0   :  { %v2622_v0 = vmov 0.0   ;;  %vm2623_vm0 = vmmov 0   ;;  %vm184_vm1 = vcmask 130048   ;;  %v2624_v2 = vmov 0   ;;  %s3149_s0 = inlined_call_operand.vmem [shape: f32[16,40], index: 0, kind: input, shape index: {}]   ;;  %s3150_s1 = inlined_call_operand.vmem [shape: bf16[48,16], index: 1, kind: input, shape index: {}]   ;;  %s3151_s2 = inlined_call_operand.vmem [shape: bf16[16,16], index: 2, kind: input, shape index: {}]   ;;  %s3152_s3 = inlined_call_operand.vmem [shape: f32[16,32], index: 3, kind: input, shape index: {}]   ;;  %s3153_s4 = inlined_call_operand.vmem [shape: f32[40,96], index: 4, kind: input, shape index: {}]   ;;  %s3154_s5 = inlined_call_operand.vmem [shape: f32[1,96], index: 5, kind: input, shape index: {}]   ;;  %s3155_s6 = inlined_call_operand.vmem [shape: f32[32,32], index: 6, kind: input, shape index: {}]   ;;  %s3156_s7 = inlined_call_operand.vmem [shape: f32[32,32], index: 7, kind: input, shape index: {}]   ;;  %s3157_s8 = inlined_call_operand.vmem [shape: f32[32,32], index: 8, kind: input, shape index: {}]   ;;  %s3158_s9 = inlined_call_operand.vmem [shape: f32[8,40], index: 9, kind: input, shape index: {}]   ;;  %s3159_s10 = inlined_call_operand.vmem [shape: bf16[8,16], index: 10, kind: input, shape index: {}]   ;;  %s3160_s11 = inlined_call_operand.vmem [shape: f32[40,32], index: 11, kind: input, shape index: {}]   ;;  %s3161_s12 = inlined_call_operand.vmem [shape: f32[32,32], index: 12, kind: input, shape index: {}]   ;;  %s3162_s13 = inlined_call_operand.vmem [shape: f32[1,32], index: 13, kind: input, shape index: {}]   ;;  %s3163_s14 = inlined_call_operand.hbm [shape: f32[16,32], index: 14, kind: output, shape index: {0}]   ;;  %s3164_s15 = inlined_call_operand.vmem [shape: f32[8,32], index: 15, kind: output, shape index: {1}]  }
   0x1   :  { %2177 = vmatprep.subr.bf16.mxu1 %v2622_v0  ;;  %2179 = vmatprep.mubr.msk.bf16.mxu1 %vm2623_vm0, %v2622_v0  ;;  %v2718_v1 = vld [vmem:[%s3150_s1] sm:$0xff]   ;;  %v76_v4 = vld [vmem:[%s3153_s4 + $0x8] sm:$0xff]  ;;  %v77_v6 = vld [vmem:[%s3153_s4 + $0x10] sm:$0xff]  ;;  %vm87_vm2 = vcmask 326656  }
   0x2   :  { %2178 = vmatpush3.bf16.msra.mxu1 %v2624_v2  ;;  %v75_v3 = vld [vmem:[%s3153_s4] sm:$0xff]  ;;  %v78_v7 = vld [vmem:[%s3153_s4 + $0x18] sm:$0xff]  ;;  %v68_v11 = vld [vmem:[%s3156_s7 + $0x8] sm:$0xff] }
   0x3   :  { %v2384_v5 = vpack.c.bf16 %v76_v4, %v75_v3  ;;  %v2388_v8 = vpack.c.bf16 %v78_v7, %v77_v6  ;;  %v51_v9 = vld [vmem:[%s3149_s0] sm:$0xff]  ;;  %v69_v12 = vld [vmem:[%s3156_s7 + $0x10] sm:$0xff]  ;;  %v70_v13 = vld [vmem:[%s3156_s7 + $0x18] sm:$0xff] }
   0x4   :  { %v67_v10 = vld [vmem:[%s3156_s7] sm:$0xff]  ;;  %2174 = vmatprep.mubr.msk.f32.mxu0 %vm87_vm2, %v51_v9  ;;  %v2754_v15 = vpack.c.bf16 %v70_v13, %v69_v12 }
   0x5   :  { %2180 = vmatmul.mubr.msk.bf16.vlgmr.msra.gmra.mrb[0].mxu1 %vm184_vm1, %v2718_v1  ;;  %2385 = vmatprep.subr.bf16.mxu0 %v2384_v5  ;;  %v2752_v14 = vpack.c.bf16 %v68_v11, %v67_v10 }
   0x6   :  { %2183 = vmatprep.mubr.msk.bf16.mxu1 %vm2623_vm0, %v2622_v0  ;;  %2387 = vmatpush3.bf16.msra.mxu0 %v2384_v5 }
   0x7   :  { %2389 = vmatprep.subr.bf16.mxu0 %v2388_v8 }
   0x8   :  { %21 = vsyncpa [#allocation3], 0  ;;  %v2759_v16 = vld [vmem:[%s3150_s1 + $0x8] sm:$0xff]   ;;  %v79_v17 = vld [vmem:[%s3153_s4 + $0x20] sm:$0xff]  ;;  %2401 = vmatprep.subr.bf16.mxu1 %v2752_v14  ;;  %vm300_vm3 = vcmask 261120   ;;  %s2627_s28 = smov 64  }
   0x9   :  { %2403 = vmatpush3.bf16.msra.mxu1 %v2752_v14  ;;  %v52_v18 = vld [vmem:[%s3149_s0 + $0x8] sm:$0xff]  ;;  %v2780_v19 = vld [vmem:[%s3151_s2] sm:$0xff]   ;;  %v2785_v20 = vld [vmem:[%s3150_s1 + $0x10] sm:$0xff]   ;;  %s2629_s29 = smov [#allocation2]  }
   0xa   :  { %2391 = vmatpush3.bf16.msra.mxu0 %v2388_v8  ;;  %2405 = vmatprep.subr.bf16.mxu1 %v2754_v15  ;;  %v63_v21 = vld [vmem:[%s3155_s6] sm:$0xff]  ;;  %v64_v22 = vld [vmem:[%s3155_s6 + $0x8] sm:$0xff]  ;;  %v65_v24 = vld [vmem:[%s3155_s6 + $0x10] sm:$0xff]  ;;  %s1968_s30 = sshll.u32 %s2629_s29, 4  ;;  %s1969_s30 = int_to_ptr.vmem [resolvable:$true] %s1968_s30 }
   0xb   :  { %2172 = vmatprep.subr.mxu0 %v79_v17  ;;  %v2800_v23 = vpack.c.bf16 %v64_v22, %v63_v21  ;;  %v66_v25 = vld [vmem:[%s3155_s6 + $0x18] sm:$0xff]  ;;  %s2625_s6 = smov 32   ;;  %v1983_v49 = vld [vmem:[%s3154_s5] ss:$0 sm:$0xff]  ;;  %v72_v3 = vld [vmem:[%s3157_s8 + $0x8] sm:$0xff]  ;;  %s2598_s0 = scalar_lea.vmem %s1969_s30, 256 }
   0xc   :  { %v2808_v26 = vpack.c.bf16 %v66_v25, %v65_v24  ;;  %v73_v4 = vld [vmem:[%s3157_s8 + $0x10] sm:$0xff]  ;;  %v74_v6 = vld [vmem:[%s3157_s8 + $0x18] sm:$0xff]  ;;  %p2599_p0 = scmp.ne.s32.totalorder %s1969_s30, %s2598_s0  ;;  %p2603_p1 = scmp.lt.s32.totalorder %s1969_s30, %s1969_s30 }
   0xd   :  { %2184 = vmatmul.mubr.msk.bf16.gmra.mrb[4].mxu1 %vm184_vm1, %v2759_v16  ;;  %v2862_v7 = vpack.c.bf16 %v74_v6, %v73_v4  ;;  %p2604_p2 = scmp.lt.s32.totalorder %s2598_s0, %s2598_s0 }
   0xe   :  { %2187 = vmatprep.mubr.msk.bf16.mxu1 %vm2623_vm0, %v2622_v0  ;;  %2173 = vmatpush3.msra.mxu0 %v79_v17 }
   0xf   :  { %2407 = vmatpush3.bf16.msra.mxu1 %v2754_v15  ;;  %2175 = vmatmul.mubr.msk.f32.vlgmr.msra.gmra.mrb[0].mxu0 %vm87_vm2, %v52_v18  ;;  %p2605_p3 = por %p2604_p2, %p2603_p1 }
  0x10   :  { %2191 = vmatprep.subr.bf16.mxu0 %v2622_v0  ;;  %2193 = vmatprep.mubr.msk.bf16.mxu0 %vm2623_vm0, %v2622_v0 }
  0x11   :  { %2192 = vmatpush3.bf16.msra.mxu0 %v2624_v2  ;;  %2250 = vmatprep.subr.bf16.mxu1 %v2622_v0  ;;  %v71_v2 = vld [vmem:[%s3157_s8] sm:$0xff]  ;;  %s2626_s8 = smov 96   ;;  %p2606_p4 = pnand %p2605_p3, %p2599_p0 }
  0x12   :  { %2393 = vmatprep.subr.bf16.mxu0 %v2800_v23  ;;  %v2857_v5 = vpack.c.bf16 %v72_v3, %v71_v2 }
  0x14   :  { %2194 = vmatmul.mubr.msk.bf16.vlgmr.msra.gmra.mrb[4].mxu0 %vm184_vm1, %v2780_v19 }
  0x15   :  { %2188 = vmatmul.mubr.msk.bf16.gmra.mrb[8].mxu1 %vm184_vm1, %v2785_v20  ;;  %2395 = vmatpush3.bf16.msra.mxu0 %v2800_v23 }
  0x16   :  { %2397 = vmatprep.subr.bf16.mxu0 %v2808_v26 }
  0x19   :  { %2399 = vmatpush3.bf16.msra.mxu0 %v2808_v26 }
  0x1a   :  { %2409 = vmatprep.subr.bf16.mxu0 %v2857_v5 }
  0xd8   :  { %v228_v27 = vpop.f32.mrb[0].mxu1 }
  0xd9   :  { %v2181_v28 = vpop.f32.mrb[1].mxu1  ;;  %2216 = vmatprep.mubr.msk.f32.mxu1 %vm300_vm3, %v228_v27 }
  0xda   :  { %v231_v29 = vpop.f32.mrb[2].mxu1 }
  0xdb   :  { %v2182_v30 = vpop.f32.mrb[3].mxu1  ;;  %2217 = vmatmul.mubr.msk.f32.vlgmr.msra.gmra.mrb[12].mxu1 %vm300_vm3, %v231_v29 }
  0xe0   :  { %v236_v31 = vpop.f32.mrb[4].mxu1 }
  0xe1   :  { %v2185_v32 = vpop.f32.mrb[5].mxu1  ;;  %2219 = vmatprep.mubr.msk.f32.mxu1 %vm300_vm3, %v236_v31 }
  0xe2   :  { %v239_v33 = vpop.f32.mrb[6].mxu1  ;;  %v2176_v35 = vpop.f32.mrb[0].mxu0 }
  0xe3   :  { %v2186_v34 = vpop.f32.mrb[7].mxu1  ;;  %2220 = vmatmul.mubr.msk.f32.gmra.mrb[14].mxu1 %vm300_vm3, %v239_v33  ;;  %v160_v36 = vpop.f32.mrb[1].mxu0  ;;  %v2834_v50 = vadd.f32 %v2176_v35, %v1983_v49 }
  0xe4   :  { %v2836_v51 = vadd.f32 %v1983_v49, %v160_v36 }
  0xe7   :  { %v2818_v37 = vpop.f32.mrb[4].mxu0 }
  0xe8   :  { %v244_v38 = vpop.f32.mrb[8].mxu1  ;;  %v2195_v39 = vpop.f32.mrb[5].mxu0  ;;  %2205 = vmatprep.mubr.msk.f32.mxu0 %vm300_vm3, %v2818_v37 }
  0xe9   :  { %v2189_v40 = vpop.f32.mrb[9].mxu1  ;;  %2222 = vmatprep.mubr.msk.f32.mxu1 %vm300_vm3, %v244_v38  ;;  %v296_v41 = vpop.f32.mrb[6].mxu0 }
  0xea   :  { %v247_v42 = vpop.f32.mrb[10].mxu1  ;;  %2206 = vmatmul.mubr.msk.f32.vlgmr.msra.gmra.mrb[2].mxu0 %vm300_vm3, %v296_v41  ;;  %v2196_v43 = vpop.f32.mrb[7].mxu0 }
  0xeb   :  { %v2190_v44 = vpop.f32.mrb[11].mxu1  ;;  %2223 = vmatmul.mubr.msk.f32.gmra.mrb[16].mxu1 %vm300_vm3, %v247_v42  ;;  %2411 = vmatpush3.bf16.msra.mxu0 %v2857_v5 }
  0xec   :  { %2252 = vmatprep.mubr.msk.bf16.mxu1 %vm2623_vm0, %v2622_v0  ;;  %2413 = vmatprep.subr.bf16.mxu0 %v2862_v7 }
  0xef   :  { %2415 = vmatpush3.bf16.msra.mxu0 %v2862_v7 }
  0xf0   :  { %2236 = vmatprep.subr.bf16.mxu0 %v2622_v0 }
 0x1ae   :  { %v2218_v45 = vpop.f32.mrb[12].mxu1 }
 0x1af   :  { %517 = vrot.lane.b32.xlu1 %v2218_v45, %s2625_s6  ;;  %v480_v46 = vpop.f32.mrb[13].mxu1 }
 0x1b0   :  { %515 = vrot.lane.b32.xlu0 %v480_v46, %s2625_s6 }
 0x1b6   :  { %v2221_v47 = vpop.f32.mrb[14].mxu1 }
 0x1b7   :  { %521 = vrot.lane.b32.xlu1 %v2221_v47, %s2625_s6  ;;  %v490_v48 = vpop.f32.mrb[15].mxu1 }
 0x1b8   :  { %519 = vrot.lane.b32.xlu0 %v490_v48, %s2625_s6 }
 0x1bd   :  { %v2207_v52 = vpop.f32.mrb[2].mxu0 }
 0x1be   :  { %v2224_v53 = vpop.f32.mrb[16].mxu1  ;;  %v383_v54 = vadd.f32 %v2207_v52, %v2834_v50  ;;  %v373_v55 = vpop.f32.mrb[3].mxu0 }
 0x1bf   :  { %525 = vrot.lane.b32.xlu1 %v2224_v53, %s2625_s6  ;;  %v500_v56 = vpop.f32.mrb[17].mxu1  ;;  %v382_v57 = vadd.f32 %v373_v55, %v2836_v51 }
 0x1c0   :  { %523 = vrot.lane.b32.xlu0 %v500_v56, %s2625_s6  ;;  %v1997_v58 = vmul.f32 -1.442695, %v383_v54 }
 0x1c1   :  { %v1996_v59 = vmul.f32 -1.442695, %v382_v57 }
 0x1c2   :  { %2490 = vpow2.f32 %v1997_v58 }
 0x1c3   :  { %579 = vrot.lane.b32.xlu1 %v236_v31, %s2625_s6  ;;  %2492 = vpow2.f32 %v1996_v59 }
 0x1c4   :  { %575 = vrot.lane.b32.xlu0 %v228_v27, %s2625_s6 }
 0x1c7   :  { %581 = vrot.lane.b32.xlu1 %v239_v33, %s2625_s6 }
 0x1c8   :  { %577 = vrot.lane.b32.xlu0 %v231_v29, %s2625_s6 }
 0x1cb   :  { %585 = vrot.lane.b32.xlu1 %v247_v42, %s2625_s6 }
 0x1cc   :  { %v2491_v60 = vpop.eup %2490  ;;  %583 = vrot.lane.b32.xlu0 %v244_v38, %s2625_s6 }
 0x1cd   :  { %v2493_v61 = vpop.eup %2492  ;;  %v391_v62 = vadd.f32 1.0, %v2491_v60 }
 0x1ce   :  { %v390_v63 = vadd.f32 1.0, %v2493_v61 }
 0x1cf   :  { %2494 = vrcp.f32 %v391_v62 }
 0x1d0   :  { %2496 = vrcp.f32 %v390_v63 }
 0x1d9   :  { %v2867_v8 = vpop.eup %2494 }
 0x1da   :  { %v2869_v9 = vpop.eup %2496  ;;  %v701_v10 = vsub.f32 1.0, %v2867_v8 }
 0x1db   :  { %v700_v11 = vsub.f32 1.0, %v2869_v9 }
 0x1dc   :  { %v2874_v12 = vmul.f32 %v701_v10, %v296_v41 }
 0x1dd   :  { %v2878_v13 = vmul.f32 %v700_v11, %v2818_v37 }
 0x221   :  { %v518_v17 = vpop.permute.xlu1 %517 }
 0x222   :  { %v516_v18 = vpop.permute.xlu0 %515  ;;  %v534_v21 = vadd.f32 %v518_v17, %v2834_v50 }
 0x223   :  { %v533_v22 = vadd.f32 %v516_v18, %v2836_v51 }
 0x224   :  { %v2005_v24 = vmul.f32 -1.442695, %v534_v21 }
 0x225   :  { %v2004_v25 = vmul.f32 -1.442695, %v533_v22 }
 0x226   :  { %2498 = vpow2.f32 %v2005_v24 }
 0x227   :  { %2500 = vpow2.f32 %v2004_v25 }
 0x229   :  { %v522_v27 = vpop.permute.xlu1 %521 }
 0x22a   :  { %v536_v28 = vadd.f32 %v522_v27, %v2834_v50  ;;  %v520_v29 = vpop.permute.xlu0 %519 }
 0x22b   :  { %v535_v30 = vadd.f32 %v520_v29, %v2836_v51 }
 0x22c   :  { %v2007_v31 = vmul.f32 -1.442695, %v536_v28 }
 0x22d   :  { %v2006_v32 = vmul.f32 -1.442695, %v535_v30 }
 0x22e   :  { %2502 = vpow2.f32 %v2007_v31 }
 0x22f   :  { %2504 = vpow2.f32 %v2006_v32 }
 0x230   :  { %v2499_v39 = vpop.eup %2498 }
 0x231   :  { %v526_v33 = vpop.permute.xlu1 %525  ;;  %v2501_v40 = vpop.eup %2500  ;;  %v558_v45 = vadd.f32 1.0, %v2499_v39  ;;  %v2902_v39 = vld [vmem:[%s3152_s3 + $0x8] sm:$0xff] }
 0x232   :  { %v538_v34 = vadd.f32 %v526_v33, %v2834_v50  ;;  %v524_v35 = vpop.permute.xlu0 %523  ;;  %v557_v46 = vadd.f32 1.0, %v2501_v40 }
 0x233   :  { %v537_v36 = vadd.f32 %v524_v35, %v2836_v51 }
 0x234   :  { %v2009_v37 = vmul.f32 -1.442695, %v538_v34 }
 0x235   :  { %v2008_v38 = vmul.f32 -1.442695, %v537_v36  ;;  %v580_v52 = vpop.permute.xlu1 %579 }
 0x236   :  { %2506 = vpow2.f32 %v2009_v37  ;;  %v576_v54 = vpop.permute.xlu0 %575 }
 0x237   :  { %2508 = vpow2.f32 %v2008_v38 }
 0x238   :  { %v2503_v41 = vpop.eup %2502 }
 0x239   :  { %v2505_v42 = vpop.eup %2504  ;;  %v560_v43 = vadd.f32 1.0, %v2503_v41  ;;  %v582_v56 = vpop.permute.xlu1 %581 }
 0x23a   :  { %v559_v44 = vadd.f32 1.0, %v2505_v42  ;;  %v578_v58 = vpop.permute.xlu0 %577  ;;  %v2909_v42 = vld [vmem:[%s3152_s3] sm:$0xff] }
 0x23b   :  { %2510 = vrcp.f32 %v560_v43 }
 0x23c   :  { %2512 = vrcp.f32 %v559_v44 }
 0x23d   :  { %2514 = vrcp.f32 %v558_v45  ;;  %v586_v4 = vpop.permute.xlu1 %585 }
 0x23e   :  { %2516 = vrcp.f32 %v557_v46  ;;  %v584_v17 = vpop.permute.xlu0 %583 }
 0x240   :  { %v2507_v47 = vpop.eup %2506 }
 0x241   :  { %v2509_v48 = vpop.eup %2508  ;;  %v562_v49 = vadd.f32 1.0, %v2507_v47 }
 0x242   :  { %v561_v53 = vadd.f32 1.0, %v2509_v48 }
 0x243   :  { %2518 = vrcp.f32 %v562_v49 }
 0x244   :  { %2520 = vrcp.f32 %v561_v53 }
 0x245   :  { %v2511_v55 = vpop.eup %2510 }
 0x246   :  { %v2513_v57 = vpop.eup %2512  ;;  %v596_v61 = vmul.f32 %v2511_v55, %v582_v56 }
 0x247   :  { %v2515_v59 = vpop.eup %2514  ;;  %v595_v62 = vmul.f32 %v2513_v57, %v580_v52 }
 0x248   :  { %v2517_v60 = vpop.eup %2516  ;;  %v594_v63 = vmul.f32 %v2515_v59, %v578_v58 }
 0x249   :  { %v593_v3 = vmul.f32 %v2517_v60, %v576_v54 }
 0x24a   :  { %v600_v10 = vadd.f32 %v596_v61, %v594_v63 }
 0x24b   :  { %v599_v18 = vadd.f32 %v595_v62, %v593_v3 }
 0x24d   :  { %v2519_v2 = vpop.eup %2518 }
 0x24e   :  { %v2521_v6 = vpop.eup %2520  ;;  %v598_v11 = vmul.f32 %v2519_v2, %v586_v4 }
 0x24f   :  { %v597_v21 = vmul.f32 %v2521_v6, %v584_v17 }
 0x250   :  { %v602_v22 = vadd.f32 %v600_v10, %v598_v11 }
 0x251   :  { %v601_v24 = vadd.f32 %v599_v18, %v597_v21 }
 0x252   :  { %607 = vrot.lane.b32.xlu1 %v602_v22, %s2626_s8 }
 0x253   :  { %605 = vrot.lane.b32.xlu0 %v601_v24, %s2626_s8 }
 0x2c4   :  { %v608_v27 = vpop.permute.xlu1 %607 }
 0x2c5   :  { %v606_v25 = vpop.permute.xlu0 %605 }
 0x2c6   :  { %2233 = vmatprep.mubr.msk.f32.mxu0 %vm300_vm3, %v606_v25 }
 0x2c7   :  { %2234 = vmatmul.mubr.msk.f32.vlgmr.msra.gmra.mrb[8].mxu0 %vm300_vm3, %v608_v27 }
 0x2c8   :  { %2238 = vmatprep.mubr.msk.bf16.mxu0 %vm2623_vm0, %v2622_v0 }
 0x39a   :  { %v2235_v28 = vpop.f32.mrb[8].mxu0 }
 0x39b   :  { %692 = vrot.lane.b32.xlu1 %v2235_v28, %s2627_s28  ;;  %v679_v29 = vpop.f32.mrb[9].mxu0 }
 0x39c   :  { %690 = vrot.lane.b32.xlu0 %v679_v29, %s2627_s28 }
 0x40d   :  { %v693_v30 = vpop.permute.xlu1 %692 }
 0x40e   :  { %v697_v31 = vadd.f32 %v693_v30, %v2834_v50  ;;  %v691_v32 = vpop.permute.xlu0 %690 }
 0x40f   :  { %v696_v33 = vadd.f32 %v691_v32, %v2836_v51 }
 0x410   :  { %2522 = vtanh.f32 %v697_v31 }
 0x411   :  { %2524 = vtanh.f32 %v696_v33 }
 0x41a   :  { %v2523_v34 = vpop.eup %2522 }
 0x41b   :  { %v2525_v35 = vpop.eup %2524  ;;  %708 = vrot.lane.b32.xlu1 %v2523_v34, %s2627_s28 }
 0x41c   :  { %706 = vrot.lane.b32.xlu0 %v2525_v35, %s2627_s28 }
 0x48d   :  { %v709_v36 = vpop.permute.xlu1 %708 }
 0x48e   :  { %v713_v37 = vmul.f32 %v2867_v8, %v709_v36  ;;  %v707_v38 = vpop.permute.xlu0 %706 }
 0x48f   :  { %v712_v40 = vmul.f32 %v2869_v9, %v707_v38 }
 0x490   :  { %v715_v41 = vadd.f32 %v713_v37, %v2874_v12 }
 0x491   :  { %v714_v43 = vadd.f32 %v712_v40, %v2878_v13 }
 0x492   :  { %v717_v44 = vmul.f32 %v715_v41, %v2902_v39 }
 0x493   :  { %v716_v8 = vmul.f32 %v714_v43, %v2909_v42 }
 0x495   :  { %v718_v45 = vpack.c.bf16 %v717_v44, %v716_v8 }
 0x497   :  { %2237 = vmatpush3.bf16.msra.mxu0 %v718_v45  ;;  %2251 = vmatpush3.bf16.msra.mxu1 %v718_v45 }
 0x498   :  { %2417 = vmatprep.subr.bf16.mxu1 %v2800_v23  ;;  %2433 = vmatprep.subr.bf16.mxu0 %v2857_v5 }
 0x49a   :  { %2239 = vmatmul.mubr.msk.bf16.vlgmr.msra.gmra.mrb[12].mxu0 %vm184_vm1, %v2718_v1  ;;  %2253 = vmatmul.mubr.msk.bf16.vlgmr.msra.gmra.mrb[20].mxu1 %vm184_vm1, %v2780_v19 }
 0x49b   :  { %2242 = vmatprep.mubr.msk.bf16.mxu0 %vm2623_vm0, %v2622_v0  ;;  %2419 = vmatpush3.bf16.msra.mxu1 %v2800_v23 }
 0x49c   :  { %2421 = vmatprep.subr.bf16.mxu1 %v2808_v26  ;;  %2435 = vmatpush3.bf16.msra.mxu0 %v2857_v5 }
 0x49d   :  { %2437 = vmatprep.subr.bf16.mxu0 %v2862_v7 }
 0x49f   :  { %2423 = vmatpush3.bf16.msra.mxu1 %v2808_v26 }
 0x4a0   :  { %2425 = vmatprep.subr.bf16.mxu1 %v2752_v14  ;;  %2439 = vmatpush3.bf16.msra.mxu0 %v2862_v7 }
 0x4a1   :  { %2295 = vmatprep.subr.bf16.mxu0 %v2622_v0 }
 0x4a2   :  { %2243 = vmatmul.mubr.msk.bf16.gmra.mrb[16].mxu0 %vm184_vm1, %v2759_v16 }
 0x4a3   :  { %2246 = vmatprep.mubr.msk.bf16.mxu0 %vm2623_vm0, %v2622_v0 }
 0x4aa   :  { %2247 = vmatmul.mubr.msk.bf16.gmra.mrb[20].mxu0 %vm184_vm1, %v2785_v20 }
 0x56d   :  { %v753_v9 = vpop.f32.mrb[12].mxu0  ;;  %v2936_v12 = vpop.f32.mrb[20].mxu1 }
 0x56e   :  { %v2240_v13 = vpop.f32.mrb[13].mxu0  ;;  %v2254_v46 = vpop.f32.mrb[21].mxu1  ;;  %2264 = vmatprep.mubr.msk.f32.mxu1 %vm300_vm3, %v2936_v12 }
 0x56f   :  { %v756_v47 = vpop.f32.mrb[14].mxu0  ;;  %v813_v48 = vpop.f32.mrb[22].mxu1 }
 0x570   :  { %v2241_v49 = vpop.f32.mrb[15].mxu0  ;;  %v2255_v52 = vpop.f32.mrb[23].mxu1  ;;  %2265 = vmatmul.mubr.msk.f32.vlgmr.msra.gmra.mrb[18].mxu1 %vm300_vm3, %v813_v48 }
 0x571   :  { %2427 = vmatpush3.bf16.msra.mxu1 %v2752_v14  ;;  %2275 = vmatprep.mubr.msk.f32.mxu1 %vm300_vm3, %v753_v9 }
 0x572   :  { %2429 = vmatprep.subr.bf16.mxu1 %v2754_v15 }
 0x575   :  { %2431 = vmatpush3.bf16.msra.mxu1 %v2754_v15  ;;  %v761_v53 = vpop.f32.mrb[16].mxu0 }
 0x576   :  { %v2244_v54 = vpop.f32.mrb[17].mxu0  ;;  %2309 = vmatprep.subr.bf16.mxu1 %v2622_v0 }
 0x577   :  { %v764_v55 = vpop.f32.mrb[18].mxu0 }
 0x578   :  { %2276 = vmatmul.mubr.msk.f32.vlgmr.msra.gmra.mrb[24].mxu1 %vm300_vm3, %v756_v47  ;;  %v2245_v56 = vpop.f32.mrb[19].mxu0 }
 0x579   :  { %2278 = vmatprep.mubr.msk.f32.mxu1 %vm300_vm3, %v761_v53 }
 0x57c   :  { %2279 = vmatmul.mubr.msk.f32.gmra.mrb[26].mxu1 %vm300_vm3, %v764_v55 }
 0x57d   :  { %v769_v57 = vpop.f32.mrb[20].mxu0 }
 0x57e   :  { %v2248_v58 = vpop.f32.mrb[21].mxu0  ;;  %2281 = vmatprep.mubr.msk.f32.mxu1 %vm300_vm3, %v769_v57 }
 0x57f   :  { %v772_v59 = vpop.f32.mrb[22].mxu0 }
 0x580   :  { %v2249_v60 = vpop.f32.mrb[23].mxu0  ;;  %2282 = vmatmul.mubr.msk.f32.gmra.mrb[28].mxu1 %vm300_vm3, %v772_v59 }
 0x581   :  { %2311 = vmatprep.mubr.msk.bf16.mxu1 %vm2623_vm0, %v2622_v0 }
 0x643   :  { %v2266_v61 = vpop.f32.mrb[18].mxu1 }
 0x644   :  { %v899_v62 = vadd.f32 %v2266_v61, %v2834_v50  ;;  %v889_v63 = vpop.f32.mrb[19].mxu1 }
 0x645   :  { %v898_v2 = vadd.f32 %v889_v63, %v2836_v51 }
 0x646   :  { %v2019_v3 = vmul.f32 -1.442695, %v899_v62 }
 0x647   :  { %v2018_v4 = vmul.f32 -1.442695, %v898_v2 }
 0x648   :  { %2526 = vpow2.f32 %v2019_v3 }
 0x649   :  { %2528 = vpow2.f32 %v2018_v4 }
 0x64b   :  { %v2277_v6 = vpop.f32.mrb[24].mxu1 }
 0x64c   :  { %1033 = vrot.lane.b32.xlu0 %v2277_v6, %s2625_s6  ;;  %v996_v10 = vpop.f32.mrb[25].mxu1 }
 0x64f   :  { %v2280_v11 = vpop.f32.mrb[26].mxu1 }
 0x650   :  { %1031 = vrot.lane.b32.xlu0 %v996_v10, %s2625_s6  ;;  %1037 = vrot.lane.b32.xlu1 %v2280_v11, %s2625_s6  ;;  %v1006_v17 = vpop.f32.mrb[27].mxu1 }
 0x652   :  { %v2527_v18 = vpop.eup %2526 }
 0x653   :  { %v2529_v21 = vpop.eup %2528  ;;  %v907_v22 = vadd.f32 1.0, %v2527_v18  ;;  %v2283_v24 = vpop.f32.mrb[28].mxu1 }
 0x654   :  { %v906_v25 = vadd.f32 1.0, %v2529_v21  ;;  %1035 = vrot.lane.b32.xlu1 %v1006_v17, %s2625_s6  ;;  %v1016_v27 = vpop.f32.mrb[29].mxu1 }
 0x655   :  { %2530 = vrcp.f32 %v907_v22  ;;  %1039 = vrot.lane.b32.xlu0 %v1016_v27, %s2625_s6 }
 0x656   :  { %2532 = vrcp.f32 %v906_v25 }
 0x658   :  { %1041 = vrot.lane.b32.xlu1 %v2283_v24, %s2625_s6 }
 0x659   :  { %1091 = vrot.lane.b32.xlu0 %v753_v9, %s2625_s6 }
 0x65c   :  { %1095 = vrot.lane.b32.xlu1 %v761_v53, %s2625_s6 }
 0x65d   :  { %1093 = vrot.lane.b32.xlu0 %v756_v47, %s2625_s6 }
 0x65f   :  { %v2964_v28 = vpop.eup %2530 }
 0x660   :  { %v2966_v29 = vpop.eup %2532  ;;  %1097 = vrot.lane.b32.xlu1 %v764_v55, %s2625_s6  ;;  %v1217_v30 = vsub.f32 1.0, %v2964_v28 }
 0x661   :  { %1099 = vrot.lane.b32.xlu0 %v769_v57, %s2625_s6  ;;  %v1216_v31 = vsub.f32 1.0, %v2966_v29 }
 0x662   :  { %v2972_v32 = vmul.f32 %v1217_v30, %v813_v48 }
 0x663   :  { %v2975_v33 = vmul.f32 %v1216_v31, %v2936_v12 }
 0x664   :  { %1101 = vrot.lane.b32.xlu1 %v772_v59, %s2625_s6 }
 0x6be   :  { %v1034_v34 = vpop.permute.xlu0 %1033 }
 0x6bf   :  { %v1050_v35 = vadd.f32 %v1034_v34, %v2834_v50 }
 0x6c1   :  { %v2027_v36 = vmul.f32 -1.442695, %v1050_v35 }
 0x6c2   :  { %v1032_v37 = vpop.permute.xlu0 %1031  ;;  %v1038_v38 = vpop.permute.xlu1 %1037 }
 0x6c3   :  { %v1049_v40 = vadd.f32 %v1032_v37, %v2836_v51  ;;  %v1052_v41 = vadd.f32 %v1038_v38, %v2834_v50  ;;  %2534 = vpow2.f32 %v2027_v36 }
 0x6c5   :  { %v2026_v43 = vmul.f32 -1.442695, %v1049_v40  ;;  %v2029_v44 = vmul.f32 -1.442695, %v1052_v41 }
 0x6c6   :  { %v1036_v8 = vpop.permute.xlu1 %1035 }
 0x6c7   :  { %2536 = vpow2.f32 %v2026_v43  ;;  %v1051_v45 = vadd.f32 %v1036_v8, %v2836_v51  ;;  %v1040_v9 = vpop.permute.xlu0 %1039 }
 0x6c8   :  { %2538 = vpow2.f32 %v2029_v44  ;;  %v1053_v12 = vadd.f32 %v1040_v9, %v2836_v51 }
 0x6c9   :  { %v2028_v13 = vmul.f32 -1.442695, %v1051_v45 }
 0x6ca   :  { %v2030_v46 = vmul.f32 -1.442695, %v1053_v12  ;;  %v1042_v47 = vpop.permute.xlu1 %1041 }
 0x6cb   :  { %2540 = vpow2.f32 %v2028_v13  ;;  %v1054_v48 = vadd.f32 %v1042_v47, %v2834_v50  ;;  %v1092_v62 = vpop.permute.xlu0 %1091 }
 0x6cc   :  { %2542 = vpow2.f32 %v2030_v46 }
 0x6cd   :  { %v2031_v49 = vmul.f32 -1.442695, %v1054_v48  ;;  %v2535_v52 = vpop.eup %2534 }
 0x6ce   :  { %v1074_v56 = vadd.f32 1.0, %v2535_v52  ;;  %v1096_v3 = vpop.permute.xlu1 %1095 }
 0x6cf   :  { %2544 = vpow2.f32 %v2031_v49  ;;  %v1094_v4 = vpop.permute.xlu0 %1093 }
 0x6d1   :  { %v2537_v53 = vpop.eup %2536 }
 0x6d2   :  { %v2539_v54 = vpop.eup %2538  ;;  %v1073_v55 = vadd.f32 1.0, %v2537_v53  ;;  %v1098_v11 = vpop.permute.xlu1 %1097 }
 0x6d3   :  { %v1076_v57 = vadd.f32 1.0, %v2539_v54  ;;  %v1100_v27 = vpop.permute.xlu0 %1099 }
 0x6d4   :  { %2546 = vrcp.f32 %v1073_v55 }
 0x6d5   :  { %v2541_v58 = vpop.eup %2540  ;;  %2548 = vrcp.f32 %v1076_v57 }
 0x6d6   :  { %v2543_v59 = vpop.eup %2542  ;;  %v1075_v60 = vadd.f32 1.0, %v2541_v58  ;;  %2550 = vrcp.f32 %v1074_v56  ;;  %v1102_v36 = vpop.permute.xlu1 %1101 }
 0x6d7   :  { %v1077_v61 = vadd.f32 1.0, %v2543_v59 }
 0x6d8   :  { %2552 = vrcp.f32 %v1075_v60 }
 0x6d9   :  { %v2545_v63 = vpop.eup %2544  ;;  %2554 = vrcp.f32 %v1077_v61 }
 0x6da   :  { %v1078_v2 = vadd.f32 1.0, %v2545_v63 }
 0x6dc   :  { %2556 = vrcp.f32 %v1078_v2 }
 0x6de   :  { %v2547_v6 = vpop.eup %2546 }
 0x6df   :  { %v2549_v10 = vpop.eup %2548  ;;  %v1109_v22 = vmul.f32 %v2547_v6, %v1092_v62 }
 0x6e0   :  { %v2551_v17 = vpop.eup %2550  ;;  %v1112_v25 = vmul.f32 %v2549_v10, %v1098_v11 }
 0x6e1   :  { %v1110_v34 = vmul.f32 %v2551_v17, %v1094_v4 }
 0x6e2   :  { %v2553_v18 = vpop.eup %2552 }
 0x6e3   :  { %v2555_v21 = vpop.eup %2554  ;;  %v1111_v24 = vmul.f32 %v2553_v18, %v1096_v3  ;;  %v1116_v37 = vadd.f32 %v1112_v25, %v1110_v34 }
 0x6e4   :  { %v1113_v30 = vmul.f32 %v2555_v21, %v1100_v27 }
 0x6e5   :  { %v1115_v31 = vadd.f32 %v1111_v24, %v1109_v22 }
 0x6e6   :  { %v2557_v35 = vpop.eup %2556 }
 0x6e7   :  { %v1117_v38 = vadd.f32 %v1115_v31, %v1113_v30  ;;  %v1114_v40 = vmul.f32 %v2557_v35, %v1102_v36 }
 0x6e9   :  { %v1118_v41 = vadd.f32 %v1116_v37, %v1114_v40  ;;  %1121 = vrot.lane.b32.xlu0 %v1117_v38, %s2626_s8 }
 0x6eb   :  { %1123 = vrot.lane.b32.xlu1 %v1118_v41, %s2626_s8 }
 0x75b   :  { %v1122_v43 = vpop.permute.xlu0 %1121 }
 0x75c   :  { %2292 = vmatprep.mubr.msk.f32.mxu0 %vm300_vm3, %v1122_v43 }
 0x75d   :  { %v1124_v44 = vpop.permute.xlu1 %1123 }
 0x75e   :  { %2293 = vmatmul.mubr.msk.f32.vlgmr.msra.gmra.mrb[10].mxu0 %vm300_vm3, %v1124_v44 }
 0x75f   :  { %2297 = vmatprep.mubr.msk.bf16.mxu0 %vm2623_vm0, %v2622_v0 }
 0x831   :  { %v2294_v8 = vpop.f32.mrb[10].mxu0 }
 0x832   :  { %1208 = vrot.lane.b32.xlu1 %v2294_v8, %s2627_s28  ;;  %v1195_v45 = vpop.f32.mrb[11].mxu0 }
 0x833   :  { %1206 = vrot.lane.b32.xlu0 %v1195_v45, %s2627_s28 }
 0x8a4   :  { %v1209_v9 = vpop.permute.xlu1 %1208 }
 0x8a5   :  { %v1213_v12 = vadd.f32 %v1209_v9, %v2834_v50  ;;  %v1207_v13 = vpop.permute.xlu0 %1206 }
 0x8a6   :  { %v1212_v46 = vadd.f32 %v1207_v13, %v2836_v51 }
 0x8a7   :  { %2558 = vtanh.f32 %v1213_v12 }
 0x8a8   :  { %2560 = vtanh.f32 %v1212_v46 }
 0x8b1   :  { %v2559_v47 = vpop.eup %2558 }
 0x8b2   :  { %v2561_v48 = vpop.eup %2560  ;;  %1224 = vrot.lane.b32.xlu1 %v2559_v47, %s2627_s28 }
 0x8b3   :  { %1222 = vrot.lane.b32.xlu0 %v2561_v48, %s2627_s28 }
 0x924   :  { %v1225_v49 = vpop.permute.xlu1 %1224 }
 0x925   :  { %v1229_v52 = vmul.f32 %v2964_v28, %v1225_v49  ;;  %v1223_v53 = vpop.permute.xlu0 %1222 }
 0x926   :  { %v1228_v54 = vmul.f32 %v2966_v29, %v1223_v53 }
 0x927   :  { %v1231_v55 = vadd.f32 %v1229_v52, %v2972_v32 }
 0x928   :  { %v1230_v56 = vadd.f32 %v1228_v54, %v2975_v33 }
 0x929   :  { %v1233_v57 = vmul.f32 %v1231_v55, %v2902_v39 }
 0x92a   :  { %v1232_v58 = vmul.f32 %v1230_v56, %v2909_v42 }
 0x92c   :  { %v1234_v59 = vpack.c.bf16 %v1233_v57, %v1232_v58 }
 0x92e   :  { %2296 = vmatpush3.bf16.msra.mxu0 %v1234_v59  ;;  %2310 = vmatpush3.bf16.msra.mxu1 %v1234_v59 }
 0x92f   :  { %2441 = vmatprep.subr.bf16.mxu1 %v2800_v23  ;;  %2457 = vmatprep.subr.bf16.mxu0 %v2857_v5 }
 0x931   :  { %2298 = vmatmul.mubr.msk.bf16.vlgmr.msra.gmra.mrb[24].mxu0 %vm184_vm1, %v2718_v1  ;;  %2312 = vmatmul.mubr.msk.bf16.vlgmr.msra.gmra.mrb[32].mxu1 %vm184_vm1, %v2780_v19 }
 0x932   :  { %2301 = vmatprep.mubr.msk.bf16.mxu0 %vm2623_vm0, %v2622_v0  ;;  %2443 = vmatpush3.bf16.msra.mxu1 %v2800_v23 }
 0x933   :  { %2445 = vmatprep.subr.bf16.mxu1 %v2808_v26  ;;  %2459 = vmatpush3.bf16.msra.mxu0 %v2857_v5 }
 0x934   :  { %2461 = vmatprep.subr.bf16.mxu0 %v2862_v7 }
 0x936   :  { %2447 = vmatpush3.bf16.msra.mxu1 %v2808_v26 }
 0x937   :  { %2449 = vmatprep.subr.bf16.mxu1 %v2752_v14  ;;  %2463 = vmatpush3.bf16.msra.mxu0 %v2862_v7 }
 0x938   :  { %2354 = vmatprep.subr.bf16.mxu0 %v2622_v0 }
 0x939   :  { %2302 = vmatmul.mubr.msk.bf16.gmra.mrb[28].mxu0 %vm184_vm1, %v2759_v16 }
 0x93a   :  { %2305 = vmatprep.mubr.msk.bf16.mxu0 %vm2623_vm0, %v2622_v0 }
 0x941   :  { %2306 = vmatmul.mubr.msk.bf16.gmra.mrb[32].mxu0 %vm184_vm1, %v2785_v20 }
 0xa04   :  { %v3024_v1 = vpop.f32.mrb[32].mxu1  ;;  %v1269_v19 = vpop.f32.mrb[24].mxu0 }
 0xa05   :  { %v2313_v23 = vpop.f32.mrb[33].mxu1  ;;  %2323 = vmatprep.mubr.msk.f32.mxu1 %vm300_vm3, %v3024_v1  ;;  %v2299_v26 = vpop.f32.mrb[25].mxu0 }
 0xa06   :  { %v1329_v5 = vpop.f32.mrb[34].mxu1  ;;  %v1272_v7 = vpop.f32.mrb[26].mxu0 }
 0xa07   :  { %2324 = vmatmul.mubr.msk.f32.vlgmr.msra.gmra.mrb[30].mxu1 %vm300_vm3, %v1329_v5  ;;  %v2314_v28 = vpop.f32.mrb[35].mxu1  ;;  %v2300_v16 = vpop.f32.mrb[27].mxu0 }
 0xa08   :  { %2451 = vmatpush3.bf16.msra.mxu1 %v2752_v14  ;;  %2334 = vmatprep.mubr.msk.f32.mxu1 %vm300_vm3, %v1269_v19 }
 0xa09   :  { %2453 = vmatprep.subr.bf16.mxu1 %v2754_v15 }
 0xa0c   :  { %2455 = vmatpush3.bf16.msra.mxu1 %v2754_v15  ;;  %v1277_v20 = vpop.f32.mrb[28].mxu0 }
 0xa0d   :  { %v2303_v29 = vpop.f32.mrb[29].mxu0 }
 0xa0e   :  { %v1280_v32 = vpop.f32.mrb[30].mxu0 }
 0xa0f   :  { %2335 = vmatmul.mubr.msk.f32.vlgmr.msra.gmra.mrb[36].mxu1 %vm300_vm3, %v1272_v7  ;;  %v2304_v33 = vpop.f32.mrb[31].mxu0 }
 0xa10   :  { %2337 = vmatprep.mubr.msk.f32.mxu1 %vm300_vm3, %v1277_v20 }
 0xa13   :  { %2338 = vmatmul.mubr.msk.f32.gmra.mrb[38].mxu1 %vm300_vm3, %v1280_v32 }
 0xa14   :  { %v1285_v60 = vpop.f32.mrb[32].mxu0 }
 0xa15   :  { %v2307_v61 = vpop.f32.mrb[33].mxu0  ;;  %2340 = vmatprep.mubr.msk.f32.mxu1 %vm300_vm3, %v1285_v60 }
 0xa16   :  { %v1288_v14 = vpop.f32.mrb[34].mxu0 }
 0xa17   :  { %2341 = vmatmul.mubr.msk.f32.gmra.mrb[40].mxu1 %vm300_vm3, %v1288_v14  ;;  %v2308_v62 = vpop.f32.mrb[35].mxu0 }
 0xa18   :  { %2368 = vmatprep.mubr.msk.f32.mxu1 %vm2623_vm0, %v2622_v0 }
 0xada   :  { %v2325_v15 = vpop.f32.mrb[30].mxu1 }
 0xadb   :  { %v1415_v63 = vadd.f32 %v2325_v15, %v2834_v50  ;;  %v1405_v2 = vpop.f32.mrb[31].mxu1 }
 0xadc   :  { %v1414_v3 = vadd.f32 %v1405_v2, %v2836_v51 }
 0xadd   :  { %v2041_v4 = vmul.f32 -1.442695, %v1415_v63 }
 0xade   :  { %v2040_v6 = vmul.f32 -1.442695, %v1414_v3 }
 0xadf   :  { %2562 = vpow2.f32 %v2041_v4 }
 0xae0   :  { %2564 = vpow2.f32 %v2040_v6 }
 0xae2   :  { %v2336_v10 = vpop.f32.mrb[36].mxu1 }
 0xae3   :  { %1549 = vrot.lane.b32.xlu0 %v2336_v10, %s2625_s6  ;;  %v1512_v11 = vpop.f32.mrb[37].mxu1 }
 0xae6   :  { %v2339_v17 = vpop.f32.mrb[38].mxu1 }
 0xae7   :  { %1547 = vrot.lane.b32.xlu0 %v1512_v11, %s2625_s6  ;;  %1553 = vrot.lane.b32.xlu1 %v2339_v17, %s2625_s6  ;;  %v1522_v18 = vpop.f32.mrb[39].mxu1 }
 0xae9   :  { %v2563_v21 = vpop.eup %2562 }
 0xaea   :  { %v2565_v22 = vpop.eup %2564  ;;  %v1423_v24 = vadd.f32 1.0, %v2563_v21  ;;  %v2342_v25 = vpop.f32.mrb[40].mxu1 }
 0xaeb   :  { %v1422_v27 = vadd.f32 1.0, %v2565_v22  ;;  %1551 = vrot.lane.b32.xlu1 %v1522_v18, %s2625_s6  ;;  %v1532_v30 = vpop.f32.mrb[41].mxu1 }
 0xaec   :  { %2566 = vrcp.f32 %v1423_v24  ;;  %1555 = vrot.lane.b32.xlu0 %v1532_v30, %s2625_s6 }
 0xaed   :  { %2568 = vrcp.f32 %v1422_v27 }
 0xaef   :  { %1557 = vrot.lane.b32.xlu1 %v2342_v25, %s2625_s6 }
 0xaf0   :  { %1607 = vrot.lane.b32.xlu0 %v1269_v19, %s2625_s6 }
 0xaf3   :  { %1611 = vrot.lane.b32.xlu1 %v1277_v20, %s2625_s6 }
 0xaf4   :  { %1609 = vrot.lane.b32.xlu0 %v1272_v7, %s2625_s6 }
 0xaf6   :  { %v3051_v31 = vpop.eup %2566 }
 0xaf7   :  { %v3053_v34 = vpop.eup %2568  ;;  %1613 = vrot.lane.b32.xlu1 %v1280_v32, %s2625_s6  ;;  %v1733_v35 = vsub.f32 1.0, %v3051_v31 }
 0xaf8   :  { %1615 = vrot.lane.b32.xlu0 %v1285_v60, %s2625_s6  ;;  %v1732_v36 = vsub.f32 1.0, %v3053_v34 }
 0xaf9   :  { %v3059_v37 = vmul.f32 %v1733_v35, %v1329_v5 }
 0xafa   :  { %v3062_v38 = vmul.f32 %v1732_v36, %v3024_v1 }
 0xafb   :  { %1617 = vrot.lane.b32.xlu1 %v1288_v14, %s2625_s6 }
 0xb55   :  { %v1550_v40 = vpop.permute.xlu0 %1549 }
 0xb56   :  { %v1566_v41 = vadd.f32 %v1550_v40, %v2834_v50 }
 0xb58   :  { %v2049_v43 = vmul.f32 -1.442695, %v1566_v41 }
 0xb59   :  { %v1548_v44 = vpop.permute.xlu0 %1547  ;;  %v1554_v8 = vpop.permute.xlu1 %1553 }
 0xb5a   :  { %v1565_v45 = vadd.f32 %v1548_v44, %v2836_v51  ;;  %v1568_v9 = vadd.f32 %v1554_v8, %v2834_v50  ;;  %2570 = vpow2.f32 %v2049_v43 }
 0xb5c   :  { %v2048_v12 = vmul.f32 -1.442695, %v1565_v45  ;;  %v2051_v13 = vmul.f32 -1.442695, %v1568_v9  ;;  %v1803_v9 = vld [vmem:[%s3161_s12] sm:$0xff] }
 0xb5d   :  { %v1552_v46 = vpop.permute.xlu1 %1551 }
 0xb5e   :  { %2572 = vpow2.f32 %v2048_v12  ;;  %v1567_v47 = vadd.f32 %v1552_v46, %v2836_v51  ;;  %v1556_v48 = vpop.permute.xlu0 %1555  ;;  %v1804_v12 = vld [vmem:[%s3161_s12 + $0x8] sm:$0xff]  ;;  %v2628_v46 = vmov 0.0|0.0  }
 0xb5f   :  { %2574 = vpow2.f32 %v2051_v13  ;;  %v1569_v49 = vadd.f32 %v1556_v48, %v2836_v51  ;;  %2464 = vmatprep.subr.bf16.mxu1 %v2628_v46 }
 0xb60   :  { %v2050_v52 = vmul.f32 -1.442695, %v1567_v47  ;;  %v1806_v47 = vld [vmem:[%s3161_s12 + $0x18] sm:$0xff] }
 0xb61   :  { %v2052_v53 = vmul.f32 -1.442695, %v1569_v49  ;;  %v1558_v54 = vpop.permute.xlu1 %1557 }
 0xb62   :  { %2576 = vpow2.f32 %v2050_v52  ;;  %v1570_v55 = vadd.f32 %v1558_v54, %v2834_v50  ;;  %v1608_v16 = vpop.permute.xlu0 %1607 }
 0xb63   :  { %2578 = vpow2.f32 %v2052_v53 }
 0xb64   :  { %v2053_v56 = vmul.f32 -1.442695, %v1570_v55  ;;  %v2571_v57 = vpop.eup %2570 }
 0xb65   :  { %v1590_v19 = vadd.f32 1.0, %v2571_v57  ;;  %v1612_v32 = vpop.permute.xlu1 %1611 }
 0xb66   :  { %2580 = vpow2.f32 %v2053_v56  ;;  %v1610_v33 = vpop.permute.xlu0 %1609 }
 0xb68   :  { %v2573_v58 = vpop.eup %2572 }
 0xb69   :  { %v2575_v59 = vpop.eup %2574  ;;  %v1589_v1 = vadd.f32 1.0, %v2573_v58  ;;  %v1614_v14 = vpop.permute.xlu1 %1613 }
 0xb6a   :  { %v1592_v23 = vadd.f32 1.0, %v2575_v59  ;;  %v1616_v6 = vpop.permute.xlu0 %1615  ;;  %v1798_v59 = vld [vmem:[%s3160_s11] sm:$0xff] }
 0xb6b   :  { %2582 = vrcp.f32 %v1589_v1 }
 0xb6c   :  { %v2577_v26 = vpop.eup %2576  ;;  %2584 = vrcp.f32 %v1592_v23  ;;  %v1797_v23 = vld [vmem:[%s3158_s9] sm:$0xff] }
 0xb6d   :  { %v2579_v5 = vpop.eup %2578  ;;  %v1591_v7 = vadd.f32 1.0, %v2577_v26  ;;  %2586 = vrcp.f32 %v1590_v19  ;;  %v1618_v21 = vpop.permute.xlu1 %1617  ;;  %v1802_v19 = vld [vmem:[%s3160_s11 + $0x20] sm:$0xff] }
 0xb6e   :  { %v1593_v28 = vadd.f32 1.0, %v2579_v5 }
 0xb6f   :  { %2588 = vrcp.f32 %v1591_v7 }
 0xb70   :  { %v2581_v20 = vpop.eup %2580  ;;  %2590 = vrcp.f32 %v1593_v28 }
 0xb71   :  { %v1594_v29 = vadd.f32 1.0, %v2581_v20 }
 0xb73   :  { %2592 = vrcp.f32 %v1594_v29 }
 0xb75   :  { %v2583_v60 = vpop.eup %2582 }
 0xb76   :  { %v2585_v61 = vpop.eup %2584  ;;  %v1625_v2 = vmul.f32 %v2583_v60, %v1608_v16 }
 0xb77   :  { %v2587_v62 = vpop.eup %2586  ;;  %v1628_v4 = vmul.f32 %v2585_v61, %v1614_v14 }
 0xb78   :  { %v1626_v17 = vmul.f32 %v2587_v62, %v1610_v33 }
 0xb79   :  { %v2589_v15 = vpop.eup %2588 }
 0xb7a   :  { %v2591_v63 = vpop.eup %2590  ;;  %v1627_v3 = vmul.f32 %v2589_v15, %v1612_v32  ;;  %v1632_v22 = vadd.f32 %v1628_v4, %v1626_v17 }
 0xb7b   :  { %v1629_v10 = vmul.f32 %v2591_v63, %v1616_v6 }
 0xb7c   :  { %v1631_v11 = vadd.f32 %v1627_v3, %v1625_v2 }
 0xb7d   :  { %v2593_v18 = vpop.eup %2592 }
 0xb7e   :  { %v1633_v24 = vadd.f32 %v1631_v11, %v1629_v10  ;;  %v1630_v25 = vmul.f32 %v2593_v18, %v1618_v21 }
 0xb80   :  { %v1634_v27 = vadd.f32 %v1632_v22, %v1630_v25  ;;  %1637 = vrot.lane.b32.xlu0 %v1633_v24, %s2626_s8 }
 0xb82   :  { %1639 = vrot.lane.b32.xlu1 %v1634_v27, %s2626_s8 }
 0xbf2   :  { %v1638_v30 = vpop.permute.xlu0 %1637 }
 0xbf3   :  { %2351 = vmatprep.mubr.msk.f32.mxu0 %vm300_vm3, %v1638_v30 }
 0xbf4   :  { %v1640_v35 = vpop.permute.xlu1 %1639 }
 0xbf5   :  { %2352 = vmatmul.mubr.msk.f32.vlgmr.msra.gmra.mrb[36].mxu0 %vm300_vm3, %v1640_v35 }
 0xbf6   :  { %2356 = vmatprep.mubr.msk.bf16.mxu0 %vm2623_vm0, %v2622_v0 }
 0xcc8   :  { %v2353_v36 = vpop.f32.mrb[36].mxu0 }
 0xcc9   :  { %1724 = vrot.lane.b32.xlu1 %v2353_v36, %s2627_s28  ;;  %v1711_v40 = vpop.f32.mrb[37].mxu0 }
 0xcca   :  { %1722 = vrot.lane.b32.xlu0 %v1711_v40, %s2627_s28 }
 0xd3b   :  { %v1725_v41 = vpop.permute.xlu1 %1724 }
 0xd3c   :  { %v1729_v43 = vadd.f32 %v1725_v41, %v2834_v50  ;;  %v1723_v44 = vpop.permute.xlu0 %1722  ;;  %v2465_v50 = vpack.c.bf16 %v1804_v12, %v1803_v9 }
 0xd3d   :  { %v1728_v8 = vadd.f32 %v1723_v44, %v2836_v51  ;;  %v1805_v51 = vld [vmem:[%s3161_s12 + $0x10] sm:$0xff] }
 0xd3e   :  { %2594 = vtanh.f32 %v1729_v43  ;;  %2466 = vmatpush3.bf16.msra.mxu1 %v2465_v50  ;;  %v2468_v48 = vpack.c.bf16 %v1806_v47, %v1805_v51 }
 0xd3f   :  { %2596 = vtanh.f32 %v1728_v8  ;;  %2467 = vmatprep.subr.bf16.mxu1 %v2628_v46 }
 0xd42   :  { %2469 = vmatpush3.bf16.msra.mxu1 %v2468_v48 }
 0xd48   :  { %v2595_v45 = vpop.eup %2594 }
 0xd49   :  { %v2597_v13 = vpop.eup %2596  ;;  %1740 = vrot.lane.b32.xlu1 %v2595_v45, %s2627_s28 }
 0xd4a   :  { %1738 = vrot.lane.b32.xlu0 %v2597_v13, %s2627_s28 }
 0xdbb   :  { %v1741_v49 = vpop.permute.xlu1 %1740 }
 0xdbc   :  { %v1745_v52 = vmul.f32 %v3051_v31, %v1741_v49  ;;  %v1739_v53 = vpop.permute.xlu0 %1738  ;;  %v1799_v31 = vld [vmem:[%s3160_s11 + $0x8] sm:$0xff] }
 0xdbd   :  { %v1744_v54 = vmul.f32 %v3053_v34, %v1739_v53 }
 0xdbe   :  { %v1747_v55 = vadd.f32 %v1745_v52, %v3059_v37  ;;  %v2471_v37 = vpack.c.bf16 %v1799_v31, %v1798_v59 }
 0xdbf   :  { %v1746_v56 = vadd.f32 %v1744_v54, %v3062_v38  ;;  %v1801_v38 = vld [vmem:[%s3160_s11 + $0x18] sm:$0xff] }
 0xdc0   :  { %v1749_v57 = vmul.f32 %v1747_v55, %v2902_v39  ;;  %v1752_v39 = vld [vmem:[%s3159_s10] sm:$0xf] }
 0xdc1   :  { %v1748_v58 = vmul.f32 %v1746_v56, %v2909_v42  ;;  %v1800_v42 = vld [vmem:[%s3160_s11 + $0x10] sm:$0xff] }
 0xdc2   :  { %1751 = vst.msk [vmem:[#allocation2 + $0x8] sm:$0xff] %vm300_vm3, %v1749_v57  ;;  %v2474_v1 = vpack.c.bf16 %v1801_v38, %v1800_v42 }
 0xdc3   :  { %1750 = vst.msk [vmem:[#allocation2] sm:$0xff] %vm300_vm3, %v1748_v58  ;;  %v1753_v34 = vpack.c.bf16 %v1749_v57, %v1748_v58 }
 0xdc5   :  { %2355 = vmatpush3.bf16.msra.mxu0 %v1753_v34 }
 0xdc6   :  { %2470 = vmatprep.subr.bf16.mxu0 %v2628_v46 }
 0xdc8   :  { %2357 = vmatmul.mubr.msk.bf16.vlgmr.msra.gmra.mrb[40].mxu0 %vm184_vm1, %v1752_v39 }
 0xdc9   :  { %2472 = vmatpush3.bf16.msra.mxu0 %v2471_v37  ;;  %2381 = vmatprep.mubr.msk.f32.mxu0 %vm2623_vm0, %v2622_v0 }
 0xdca   :  { %2473 = vmatprep.subr.bf16.mxu0 %v2628_v46 }
 0xdcd   :  { %2475 = vmatpush3.bf16.msra.mxu0 %v2474_v1 }
 0xdce   :  { %2379 = vmatprep.subr.mxu0 %v2622_v0 }
 0xdd1   :  { %2380 = vmatpush3.msra.mxu0 %v1802_v19 }
 0xdd2   :  { %2382 = vmatmul.mubr.msk.f32.vlgmr.msra.gmra.mrb[38].mxu0 %vm87_vm2, %v1797_v23 }
 0xe9b   :  { %v1791_v26 = vpop.f32.mrb[40].mxu0 }
 0xe9c   :  { %v2358_v5 = vpop.f32.mrb[41].mxu0  ;;  %2369 = vmatmul.mubr.msk.f32.vlgmr.msra.gmra.mrb[42].mxu1 %vm300_vm3, %v1791_v26 }
 0xe9d   :  { %v1794_v7 = vpop.f32.mrb[42].mxu0 }
 0xe9e   :  { %v2359_v28 = vpop.f32.mrb[43].mxu0 }
 0xea5   :  { %v1949_v16 = vpop.f32.mrb[38].mxu0 }
 0xea6   :  { %v2383_v20 = vpop.f32.mrb[39].mxu0 }
 0xea7   :  { %2609 = shalt.err (!%p2606_p4)
}
 0xea8   :  { %s2610_s2 = scalar_lea.hbm %s3163_s14, 256 }
 0xea9   :  { %p2611_p5 = scmp.ne.s32.totalorder %s3163_s14, %s2610_s2  ;;  %p2614_p6 = scmp.lt.u32.totalorder %s2610_s2, %s3163_s14 }
 0xeab   :  { %p2616_p7 = pnand %p2614_p6, %p2611_p5 }
 0xead   :  { %2619 = shalt.err (!%p2616_p7)
}
 0xeae   :  { %s2630_s18 = smov 128   ;;  %s2631_s19 = smov 8   ;;  %v2059_v29 = vld [vmem:[%s3162_s13] ss:$0 sm:$0xff] }
 0xeaf   :  { %1974 = dma.vmem_to_hbm [thread:$0]  %s1969_s30, 256, %s3163_s14, [#allocation3], %s2630_s18, %s2630_s18, %s2631_s19  }
 0xf6f   :  { %v1876_v0 = vpop.f32.mrb[42].mxu1 }
 0xf70   :  { %v1950_v32 = vadd.f32 %v1949_v16, %v1876_v0  ;;  %v2370_v33 = vpop.f32.mrb[43].mxu1 }
 0xf72   :  { %v1960_v60 = vadd.f32 %v2059_v29, %v1950_v32 }
 0xf74   :  { %v1961_v61 = vmax.f32 %v1960_v60, 0.0 }
 0xf76   :  { %1962 = vst.msk [vmem:[%s3164_s15] sm:$0xff] %vm300_vm3, %v1961_v61 }
 0xf77   :  { %2620 = dma.done.wait [#allocation3], 256  }
 0xf78   :  { %2621 = vsyncadd [#allocation3], 4294967040 }
 0xf79   :  { %1982 = vsyncpa [#allocation3], 1 }

</bundles_post_ra>
